<compile_context>
chip_gen: v7x
topology: tpu7x:2x2x1
jax: 0.10.0
libtpu: 0.0.40
codegen_flags: <defaults>
</compile_context>

<pallas_src>
import functools

import jax
import jax.numpy as jnp
from jax import lax
from jax.experimental import pallas as pl
from jax.experimental.pallas import tpu as pltpu

_EPS = 1e-5


# --------------------------------------------------------------------------
# Helpers: dtype/chip-aware sizing
# --------------------------------------------------------------------------
def _min_sublane_rows(dtype):
    """Min second-to-last block dim: 8 for f32, 16 for bf16, 32 for int8/fp8."""
    itemsize = jnp.dtype(dtype).itemsize
    return max(8, 32 // itemsize)


def _vmem_budget():
    """(per-step working-set target, scoped vmem_limit_bytes) for this chip."""
    try:
        cap = int(pltpu.get_tpu_info().vmem_capacity_bytes)
    except Exception:  # conservative fallback: v7x has 64 MiB per TensorCore
        cap = 64 * 1024 * 1024
    limit = min((cap * 3) // 4, 96 * 1024 * 1024)
    target = limit // 2  # headroom for compiler scratch / regalloc
    return target, limit


def _round_up(x, m):
    return ((x + m - 1) // m) * m


def _pick_tile_rows(rows, per_row_bytes, sublane, target_bytes):
    """Largest sublane-multiple row tile that fits the VMEM target, but with
    enough grid steps (~4) for megacore sharding and pipeline overlap."""
    tile = max(sublane, (target_bytes // max(per_row_bytes, 1)) // sublane * sublane)
    four_step = _round_up(max(-(-rows // 4), 1), sublane)
    tile = min(tile, _round_up(rows, sublane), max(four_step, sublane))
    return tile


# --------------------------------------------------------------------------
# Fast path: whole row resident in VMEM
# --------------------------------------------------------------------------
def _ada_instance_kernel(content_ref, style_ref, out_ref):
    """content/style/out: (TILE_R, HW*) VMEM tiles; one row per (n, c)."""
    c = content_ref[...].astype(jnp.float32)
    s = style_ref[...].astype(jnp.float32)

    hw_c = c.shape[-1]
    hw_s = s.shape[-1]

    # Per-row content mean (lane-axis reduction -> XLU slot).
    c_mean = jnp.sum(c, axis=-1, keepdims=True) * jnp.float32(1.0 / hw_c)

    # Per-row unbiased style variance (torch .var default correction=1),
    # two-pass centered form for numerical stability.
    s_mean = jnp.sum(s, axis=-1, keepdims=True) * jnp.float32(1.0 / hw_s)
    s_centered = s - s_mean
    s_var = jnp.sum(s_centered * s_centered, axis=-1, keepdims=True) * jnp.float32(
        1.0 / (hw_s - 1)
    )

    # rsqrt goes to the EUP; turns per-element divides into multiplies.
    inv_std = lax.rsqrt(s_var + jnp.float32(_EPS))
    out_ref[...] = ((c - c_mean) * inv_std).astype(out_ref.dtype)


# --------------------------------------------------------------------------
# Large-H*W fallback: chunked stats pass + elementwise normalize pass
# --------------------------------------------------------------------------
def _ada_stats_kernel(content_ref, style_ref, cmean_ref, istd_ref,
                      csum_ref, ssum_ref, ssq_ref, *, hw, chunk):
    j = pl.program_id(1)

    @pl.when(j == 0)
    def _():
        csum_ref[...] = jnp.zeros_like(csum_ref)
        ssum_ref[...] = jnp.zeros_like(ssum_ref)
        ssq_ref[...] = jnp.zeros_like(ssq_ref)

    c = content_ref[...].astype(jnp.float32)
    s = style_ref[...].astype(jnp.float32)

    # Mask lanes past the end of the row (ragged last hw chunk): OOB lanes of
    # the input block hold stale VMEM data and must not pollute the sums.
    col = lax.broadcasted_iota(jnp.int32, c.shape, 1) + j * chunk
    valid = (col < hw).astype(jnp.float32)
    c = c * valid
    s = s * valid

    csum_ref[...] += jnp.sum(c, axis=-1, keepdims=True)
    ssum_ref[...] += jnp.sum(s, axis=-1, keepdims=True)
    ssq_ref[...] += jnp.sum(s * s, axis=-1, keepdims=True)

    @pl.when(j == pl.num_programs(1) - 1)
    def _():
        inv_hw = jnp.float32(1.0 / hw)
        s_mean = ssum_ref[...] * inv_hw
        s_var = (ssq_ref[...] - ssum_ref[...] * s_mean) * jnp.float32(1.0 / (hw - 1))
        s_var = jnp.maximum(s_var, jnp.float32(0.0))
        cmean_ref[...] = csum_ref[...] * inv_hw
        istd_ref[...] = lax.rsqrt(s_var + jnp.float32(_EPS))


def _ada_normalize_kernel(content_ref, cmean_ref, istd_ref, out_ref):
    c = content_ref[...].astype(jnp.float32)
    out_ref[...] = ((c - cmean_ref[...]) * istd_ref[...]).astype(out_ref.dtype)


# --------------------------------------------------------------------------
# Wrapper
# --------------------------------------------------------------------------
def driver_ada_instance_forward(content_feat, style_feat, *, tile_rows=None,
                                hw_chunk=None, force_chunked=False):
    """content_feat, style_feat: (N, C, H, W). Returns (N, C, H, W)."""
    assert content_feat.ndim == 4 and style_feat.ndim == 4
    assert content_feat.shape[:2] == style_feat.shape[:2]
    assert content_feat.dtype == style_feat.dtype

    N, C, Hc, Wc = content_feat.shape
    _, _, Hs, Ws = style_feat.shape
    rows = N * C
    hw_c = Hc * Wc
    hw_s = Hs * Ws
    assert hw_c > 1 and hw_s > 1, "unbiased variance needs H*W > 1"

    dtype = content_feat.dtype
    itemsize = jnp.dtype(dtype).itemsize
    sublane = _min_sublane_rows(dtype)
    target_bytes, vmem_limit = _vmem_budget()

    c2d = content_feat.reshape(rows, hw_c)
    s2d = style_feat.reshape(rows, hw_s)

    # Per-row working set of the single-pass kernel: 2 inputs + 1 output,
    # double-buffered in native dtype, plus ~4 f32 temporaries in the body.
    per_row_single = itemsize * (4 * hw_c + 2 * hw_s) + 4 * (2 * hw_c + 2 * hw_s)
    single_fits = sublane * per_row_single <= target_bytes

    if (not force_chunked and single_fits) or (hw_c != hw_s):
        if tile_rows is None:
            tile_rows = _pick_tile_rows(rows, per_row_single, sublane, target_bytes)
        assert tile_rows % sublane == 0
        cost = pl.CostEstimate(
            flops=int(rows * (3 * hw_c + 4 * hw_s)),
            transcendentals=int(rows),
            bytes_accessed=int(rows * (2 * hw_c + hw_s) * itemsize),
        )
        out2d = pl.pallas_call(
            _ada_instance_kernel,
            out_shape=jax.ShapeDtypeStruct((rows, hw_c), dtype),
            grid=(pl.cdiv(rows, tile_rows),),
            in_specs=[
                pl.BlockSpec((tile_rows, hw_c), lambda i: (i, 0)),
                pl.BlockSpec((tile_rows, hw_s), lambda i: (i, 0)),
            ],
            out_specs=pl.BlockSpec((tile_rows, hw_c), lambda i: (i, 0)),
            compiler_params=pltpu.CompilerParams(
                dimension_semantics=("parallel",),
                vmem_limit_bytes=vmem_limit,
            ),
            cost_estimate=cost,
        )(c2d, s2d)
        return out2d.reshape(N, C, Hc, Wc)

    # ---------------- chunked fallback (very large H*W) ----------------
    hw = hw_c
    if hw_chunk is None:
        hw_chunk = min(_round_up(hw, 128), 8192)
    assert hw_chunk % 128 == 0

    # stats pass: content + style chunks (double buffered) + f32 temps
    per_row_chunk = itemsize * (4 * hw_chunk + 2 * hw_chunk) + 4 * (4 * hw_chunk) + 6 * 4
    if tile_rows is None:
        tile_rows = _pick_tile_rows(rows, per_row_chunk, sublane, target_bytes)
    assert tile_rows % sublane == 0

    n_row_blocks = pl.cdiv(rows, tile_rows)
    n_chunks = pl.cdiv(hw, hw_chunk)

    cmean, istd = pl.pallas_call(
        functools.partial(_ada_stats_kernel, hw=hw, chunk=hw_chunk),
        out_shape=(
            jax.ShapeDtypeStruct((rows, 1), jnp.float32),
            jax.ShapeDtypeStruct((rows, 1), jnp.float32),
        ),
        grid=(n_row_blocks, n_chunks),
        in_specs=[
            pl.BlockSpec((tile_rows, hw_chunk), lambda i, j: (i, j)),
            pl.BlockSpec((tile_rows, hw_chunk), lambda i, j: (i, j)),
        ],
        out_specs=(
            pl.BlockSpec((tile_rows, 1), lambda i, j: (i, 0)),
            pl.BlockSpec((tile_rows, 1), lambda i, j: (i, 0)),
        ),
        scratch_shapes=[
            pltpu.VMEM((tile_rows, 1), jnp.float32),
            pltpu.VMEM((tile_rows, 1), jnp.float32),
            pltpu.VMEM((tile_rows, 1), jnp.float32),
        ],
        compiler_params=pltpu.CompilerParams(
            dimension_semantics=("parallel", "arbitrary"),
            vmem_limit_bytes=vmem_limit,
        ),
        cost_estimate=pl.CostEstimate(
            flops=int(rows * 5 * hw),
            transcendentals=int(rows),
            bytes_accessed=int(rows * 2 * hw * itemsize),
        ),
    )(c2d, s2d)

    out2d = pl.pallas_call(
        _ada_normalize_kernel,
        out_shape=jax.ShapeDtypeStruct((rows, hw), dtype),
        grid=(n_row_blocks, n_chunks),
        in_specs=[
            pl.BlockSpec((tile_rows, hw_chunk), lambda i, j: (i, j)),
            pl.BlockSpec((tile_rows, 1), lambda i, j: (i, 0)),
            pl.BlockSpec((tile_rows, 1), lambda i, j: (i, 0)),
        ],
        out_specs=pl.BlockSpec((tile_rows, hw_chunk), lambda i, j: (i, j)),
        compiler_params=pltpu.CompilerParams(
            dimension_semantics=("parallel", "arbitrary"),
            vmem_limit_bytes=vmem_limit,
        ),
        cost_estimate=pl.CostEstimate(
            flops=int(rows * 2 * hw),
            transcendentals=0,
            bytes_accessed=int(rows * 2 * hw * itemsize),
        ),
    )(c2d, cmean, istd)
    return out2d.reshape(N, C, Hc, Wc)


# --------------------------------------------------------------------------
# Pure-JAX reference
# --------------------------------------------------------------------------
def _reference(content_feat, style_feat, eps=_EPS):
    N, C = content_feat.shape[:2]
    c = content_feat.reshape(N, C, -1)
    s = style_feat.reshape(N, C, -1)
    c_mean = c.mean(axis=2).reshape(N, C, 1, 1)
    s_var = s.var(axis=2, ddof=1) + eps
    s_std = jnp.sqrt(s_var).reshape(N, C, 1, 1)
    return (content_feat - c_mean) / s_std


if __name__ == "__main__":
    key = jax.random.PRNGKey(0)
    k1, k2, k3, k4, k5, k6 = jax.random.split(key, 6)

    # 1) Primary small-shape check (typical NCHW usage of the module).
    N, C, H, W = 2, 4, 16, 16
    content = jax.random.normal(k1, (N, C, H, W), dtype=jnp.float32)
    style = jax.random.normal(k2, (N, C, H, W), dtype=jnp.float32) * 2.0 + 0.5
    out = jax.block_until_ready(driver_ada_instance_forward(content, style))
    ref = _reference(content, style)
    assert out.shape == (N, C, H, W)
    assert jnp.allclose(out, ref, atol=1e-4, rtol=1e-4), "mismatch (single pass)"

    # 2) Rows (N*C=12) not a multiple of the forced 8-row tile: ragged last
    #    row block (no host padding), multi-step parallel grid.
    N2, C2 = 2, 6
    content2 = jax.random.normal(k3, (N2, C2, H, W), dtype=jnp.float32)
    style2 = jax.random.normal(k4, (N2, C2, H, W), dtype=jnp.float32) * 0.7 - 1.0
    out2 = jax.block_until_ready(
        driver_ada_instance_forward(content2, style2, tile_rows=8)
    )
    ref2 = _reference(content2, style2)
    assert jnp.allclose(out2, ref2, atol=1e-4, rtol=1e-4), "mismatch (ragged rows)"

    # 3) Force the chunked large-H*W path on a small shape (hw=256, chunk=128).
    out3 = jax.block_until_ready(
        driver_ada_instance_forward(content, style, force_chunked=True, hw_chunk=128)
    )
    assert jnp.allclose(out3, ref, atol=1e-4, rtol=1e-4), "mismatch (chunked)"

    # 4) Chunked path with ragged rows AND a ragged last hw chunk (hw=160).
    N4, C4, H4, W4 = 2, 6, 16, 10
    content4 = jax.random.normal(k5, (N4, C4, H4, W4), dtype=jnp.float32)
    style4 = jax.random.normal(k6, (N4, C4, H4, W4), dtype=jnp.float32) * 1.3 + 0.2
    out4 = jax.block_until_ready(
        driver_ada_instance_forward(content4, style4, force_chunked=True, hw_chunk=128)
    )
    ref4 = _reference(content4, style4)
    assert jnp.allclose(out4, ref4, atol=1e-4, rtol=1e-4), "mismatch (chunked ragged)"

    print("KERNEL_OK")
</pallas_src>

<mosaic_0001>
module attributes {stable_mosaic.version = 11 : i64} {
  func.func @_ada_instance_kernel(%arg0: i32, %arg1: memref<8x256xf32, #tpu.memory_space<vmem>>, %arg2: memref<8x256xf32, #tpu.memory_space<vmem>>, %arg3: memref<8x256xf32, #tpu.memory_space<vmem>>) attributes {dimension_semantics = [#tpu.dimension_semantics<parallel>], iteration_bounds = array<i64: 1>, scalar_prefetch = 0 : i64, scratch_operands = 0 : i64, tpu.core_type = #tpu.core_type<tc>, window_params = [{transform_indices = @transform_0, window_bounds = array<i64: 8, 256>}, {transform_indices = @transform_1, window_bounds = array<i64: 8, 256>}, {transform_indices = @transform_2, window_bounds = array<i64: 8, 256>}]} {
    %c0 = arith.constant 0 : index
    %c0_0 = arith.constant 0 : index
    %0 = vector.load %arg1[%c0, %c0_0] : memref<8x256xf32, #tpu.memory_space<vmem>>, vector<8x256xf32>
    %c0_1 = arith.constant 0 : index
    %c0_2 = arith.constant 0 : index
    %1 = vector.load %arg2[%c0_1, %c0_2] : memref<8x256xf32, #tpu.memory_space<vmem>>, vector<8x256xf32>
    %cst = arith.constant dense<0.000000e+00> : vector<8xf32>
    %2 = vector.multi_reduction <add>, %0, %cst [1] : vector<8x256xf32> to vector<8xf32>
    %3 = vector.shape_cast %2 : vector<8xf32> to vector<8x1xf32>
    %cst_3 = arith.constant 3.906250e-03 : f32
    %4 = vector.broadcast %cst_3 : f32 to vector<8x1xf32>
    %5 = arith.mulf %3, %4 : vector<8x1xf32>
    %cst_4 = arith.constant dense<0.000000e+00> : vector<8xf32>
    %6 = vector.multi_reduction <add>, %1, %cst_4 [1] : vector<8x256xf32> to vector<8xf32>
    %7 = vector.shape_cast %6 : vector<8xf32> to vector<8x1xf32>
    %cst_5 = arith.constant 3.906250e-03 : f32
    %8 = vector.broadcast %cst_5 : f32 to vector<8x1xf32>
    %9 = arith.mulf %7, %8 : vector<8x1xf32>
    %10 = vector.broadcast %9 : vector<8x1xf32> to vector<8x256xf32>
    %11 = arith.subf %1, %10 : vector<8x256xf32>
    %12 = arith.mulf %11, %11 : vector<8x256xf32>
    %cst_6 = arith.constant dense<0.000000e+00> : vector<8xf32>
    %13 = vector.multi_reduction <add>, %12, %cst_6 [1] : vector<8x256xf32> to vector<8xf32>
    %14 = vector.shape_cast %13 : vector<8xf32> to vector<8x1xf32>
    %cst_7 = arith.constant 0.00392156886 : f32
    %15 = vector.broadcast %cst_7 : f32 to vector<8x1xf32>
    %16 = arith.mulf %14, %15 : vector<8x1xf32>
    %cst_8 = arith.constant 9.99999974E-6 : f32
    %17 = vector.broadcast %cst_8 : f32 to vector<8x1xf32>
    %18 = arith.addf %16, %17 : vector<8x1xf32>
    %19 = math.rsqrt %18 : vector<8x1xf32>
    %20 = vector.broadcast %5 : vector<8x1xf32> to vector<8x256xf32>
    %21 = arith.subf %0, %20 : vector<8x256xf32>
    %22 = vector.broadcast %19 : vector<8x1xf32> to vector<8x256xf32>
    %23 = arith.mulf %21, %22 : vector<8x256xf32>
    %c0_9 = arith.constant 0 : index
    %c0_10 = arith.constant 0 : index
    %24 = vector.load %arg3[%c0_9, %c0_10] : memref<8x256xf32, #tpu.memory_space<vmem>>, vector<8x256xf32>
    tpu.vector_store %arg3[%c0_9, %c0_10], %23 {strides = array<i32>} : memref<8x256xf32, #tpu.memory_space<vmem>>, vector<8x256xf32>,
    return
  }
  func.func @transform_0(%arg0: i32) -> (i32, i32) {
    %c0_i32 = arith.constant 0 : i32
    %c0_i32_0 = arith.constant 0 : i32
    return %arg0, %c0_i32 : i32, i32
  }
  func.func @transform_1(%arg0: i32) -> (i32, i32) {
    %c0_i32 = arith.constant 0 : i32
    %c0_i32_0 = arith.constant 0 : i32
    return %arg0, %c0_i32 : i32, i32
  }
  func.func @transform_2(%arg0: i32) -> (i32, i32) {
    %c0_i32 = arith.constant 0 : i32
    %c0_i32_0 = arith.constant 0 : i32
    return %arg0, %c0_i32 : i32, i32
  }
}

</mosaic_0001>

<bundles_post_ra>
// kernel: tpu_custom_call.1
= control target key start
LH: loop header
LB: loop body
LE: loop exit
PB: predicated region body
PF: predicated region fallthrough
CT: control target
= control target key end

     0   :  { %7 = vsyncpa [#allocation3], 0  ;;  %s211_s0 = inlined_call_operand.hbm [shape: f32[8,256], index: 0, kind: input, shape index: {}]   ;;  %s212_s1 = inlined_call_operand.hbm [shape: f32[8,256], index: 1, kind: input, shape index: {}]   ;;  %s213_s2 = inlined_call_operand.hbm [shape: f32[8,256], index: 2, kind: output, shape index: {}]  }
   0x1   :  { %8 = vsyncpa [#allocation6], 0 }
   0x2   :  { %9 = vsyncpa [#allocation4], 0  ;;  %s157_s9 = smov [#allocation2]   ;;  %s158_s11 = smov [#allocation5]  }
   0x3   :  { %s16_s10 = sshll.u32 %s157_s9, 4  ;;  %s26_s12 = sshll.u32 %s158_s11, 4  ;;  %s17_s10 = int_to_ptr.vmem [resolvable:$true] %s16_s10  ;;  %s27_s12 = int_to_ptr.vmem [resolvable:$true] %s26_s12 }
   0x4   :  { %s85_s15 = scalar_lea.hbm %s211_s0, 256 }
   0x5   :  { %p86_p0 = scmp.ne.s32.totalorder %s211_s0, %s85_s15  ;;  %p89_p1 = scmp.lt.u32.totalorder %s85_s15, %s211_s0 }
   0x7   :  { %p91_p2 = pnand %p89_p1, %p86_p0 }
   0x9   :  { %94 = shalt.err (!%p91_p2)
}
   0xa   :  { %s95_s20 = scalar_lea.vmem %s17_s10, 256  ;;  %p100_p4 = scmp.lt.s32.totalorder %s17_s10, %s17_s10 }
   0xb   :  { %p96_p3 = scmp.ne.s32.totalorder %s17_s10, %s95_s20  ;;  %p101_p5 = scmp.lt.s32.totalorder %s95_s20, %s95_s20 }
   0xd   :  { %p102_p6 = por %p101_p5, %p100_p4 }
   0xf   :  { %p103_p7 = pnand %p102_p6, %p96_p3 }
  0x11   :  { %106 = shalt.err (!%p103_p7)
}
  0x12   :  { %19 = dma.hbm_to_vmem [thread:$0]  %s211_s0, 256, %s17_s10, [#allocation3]  }
  0x13   :  { %s107_s25 = scalar_lea.hbm %s212_s1, 256 }
  0x14   :  { %p108_p8 = scmp.ne.s32.totalorder %s212_s1, %s107_s25  ;;  %p111_p9 = scmp.lt.u32.totalorder %s107_s25, %s212_s1 }
  0x16   :  { %p113_p10 = pnand %p111_p9, %p108_p8 }
  0x18   :  { %116 = shalt.err (!%p113_p10)
}
  0x19   :  { %s117_s30 = scalar_lea.vmem %s27_s12, 256  ;;  %p122_p12 = scmp.lt.s32.totalorder %s27_s12, %s27_s12 }
  0x1a   :  { %p118_p11 = scmp.ne.s32.totalorder %s27_s12, %s117_s30  ;;  %p123_p13 = scmp.lt.s32.totalorder %s117_s30, %s117_s30 }
  0x1c   :  { %p124_p0 = por %p123_p13, %p122_p12 }
  0x1e   :  { %p125_p1 = pnand %p124_p0, %p118_p11 }
  0x20   :  { %128 = shalt.err (!%p125_p1)
}
  0x21   :  { %29 = dma.hbm_to_vmem [thread:$0]  %s212_s1, 256, %s27_s12, [#allocation6]  }
  0x22   :  { %151 = dma.done.wait [#allocation3], 256  }
  0x23   :  { %152 = vsyncadd [#allocation3], 4294967040 }
  0x24   :  { %153 = dma.done.wait [#allocation6], 256  }
  0x25   :  { %154 = vsyncadd [#allocation6], 4294967040  ;;  %v38_v0 = vld [vmem:[#allocation5] sm:$0xff]  ;;  %v39_v1 = vld [vmem:[#allocation5 + $0x8] sm:$0xff]  ;;  %s159_s1 = smov [#allocation7]  }
  0x26   :  { %v44_v2 = vadd.f32 %v39_v1, %v38_v0  ;;  %v36_v3 = vld [vmem:[#allocation2] sm:$0xff]  ;;  %v37_v4 = vld [vmem:[#allocation2 + $0x8] sm:$0xff]  ;;  %s70_s4 = sshll.u32 %s159_s1, 4  ;;  %s71_s4 = int_to_ptr.vmem [resolvable:$true] %s70_s4 }
  0x27   :  { %v40_v5 = vadd.f32 %v37_v4, %v36_v3  ;;  %s129_s5 = scalar_lea.vmem %s71_s4, 256  ;;  %p134_p3 = scmp.lt.s32.totalorder %s71_s4, %s71_s4 }
  0x28   :  { %45 = vadd.xlane.f32.xlu0 %v44_v2  ;;  %p130_p2 = scmp.ne.s32.totalorder %s71_s4, %s129_s5  ;;  %p135_p4 = scmp.lt.s32.totalorder %s129_s5, %s129_s5 }
  0x29   :  { %41 = vadd.xlane.f32.xlu1 %v40_v5 }
  0x2a   :  { %p136_p5 = por %p135_p4, %p134_p3 }
  0x2c   :  { %p137_p6 = pnand %p136_p5, %p130_p2 }
  0xb5   :  { %v46_v6 = vpop.xlane.xlu0 %45 }
  0xb6   :  { %v47_v7 = vmul.f32 0.00390625, %v46_v6  ;;  %v42_v16 = vpop.xlane.xlu1 %41 }
  0xb7   :  { %v43_v17 = vmul.f32 0.00390625, %v42_v16 }
  0xb8   :  { %v48_v8 = vsub.f32 %v38_v0, %v47_v7  ;;  %v49_v9 = vsub.f32 %v39_v1, %v47_v7 }
  0xb9   :  { %v58_v18 = vsub.f32 %v36_v3, %v43_v17  ;;  %v59_v19 = vsub.f32 %v37_v4, %v43_v17 }
  0xba   :  { %v50_v10 = vmul.f32 %v48_v8, %v48_v8  ;;  %v51_v11 = vmul.f32 %v49_v9, %v49_v9 }
  0xbc   :  { %v52_v12 = vadd.f32 %v51_v11, %v50_v10 }
  0xbe   :  { %53 = vadd.xlane.f32.xlu0 %v52_v12 }
 0x14b   :  { %v54_v13 = vpop.xlane.xlu0 %53 }
 0x14c   :  { %v55_v14 = vmul.f32 0.003921569, %v54_v13 }
 0x14e   :  { %v56_v15 = vadd.f32 1e-05, %v55_v14 }
 0x150   :  { %83 = vrsqrt.f32 %v56_v15 }
 0x15a   :  { %v84_v20 = vpop.eup %83 }
 0x15b   :  { %v60_v21 = vmul.f32 %v84_v20, %v58_v18  ;;  %v61_v22 = vmul.f32 %v84_v20, %v59_v19 }
 0x15d   :  { %62 = vst [vmem:[#allocation7] sm:$0xff] %v60_v21  ;;  %63 = vst [vmem:[#allocation7 + $0x8] sm:$0xff] %v61_v22 }
 0x15e   :  { %140 = shalt.err (!%p137_p6)
}
 0x15f   :  { %s141_s8 = scalar_lea.hbm %s213_s2, 256 }
 0x160   :  { %p142_p7 = scmp.ne.s32.totalorder %s213_s2, %s141_s8  ;;  %p145_p8 = scmp.lt.u32.totalorder %s141_s8, %s213_s2 }
 0x162   :  { %p147_p9 = pnand %p145_p8, %p142_p7 }
 0x164   :  { %150 = shalt.err (!%p147_p9)
}
 0x165   :  { %73 = dma.vmem_to_hbm [thread:$0]  %s71_s4, 256, %s213_s2, [#allocation4]  }
 0x166   :  { %155 = dma.done.wait [#allocation4], 256  }
 0x167   :  { %156 = vsyncadd [#allocation4], 4294967040 }
 0x168   :  { %77 = vsyncpa [#allocation3], 1 }
 0x169   :  { %78 = vsyncpa [#allocation6], 1 }
 0x16a   :  { %79 = vsyncpa [#allocation4], 1 }

</bundles_post_ra>
